<compile_context>
chip_gen: v5e
topology: v5e:2x2
jax: 0.10.0
libtpu: 0.0.40
codegen_flags: <defaults>
</compile_context>

<pallas_src>
import jax
import jax.numpy as jnp
from jax import lax
from jax.experimental import pallas as pl
from jax.experimental.pallas import tpu as pltpu


# ---------------------------------------------------------------------------
# Pallas kernel: fused down -> mid(+hoisted cond half) -> up -> *scale
# ---------------------------------------------------------------------------
def _lllite_kernel(scale_ref,   # SMEM (1,) f32 : strength * tk_strength
                   x_ref,       # (TS, in_dim)   compute dtype
                   cmid_ref,    # (TS, mlp_dim)  f32 (cond-emb half of mid + b_mid)
                   wd_ref,      # (in_dim, mlp_dim)
                   bd_ref,      # (1, mlp_dim)   f32
                   wmh_ref,     # (mlp_dim, mlp_dim)
                   wu_ref,      # (mlp_dim, in_dim)
                   bu_ref,      # (1, in_dim)    f32
                   o_ref):      # (TS, in_dim)   x dtype
    # down: ReLU(x @ Wd + bd) — MXU in input dtype, f32 accumulate / epilogue
    h = jnp.dot(x_ref[...], wd_ref[...], preferred_element_type=jnp.float32)
    h = jnp.maximum(h + bd_ref[...], 0.0)

    # mid: ReLU(h @ Wm_h + c_mid)   (cond-emb half precomputed & cached)
    m = jnp.dot(h.astype(wmh_ref.dtype), wmh_ref[...],
                preferred_element_type=jnp.float32)
    m = jnp.maximum(m + cmid_ref[...], 0.0)

    # up + scale epilogue (scale = mask(=1) * strength * tk_strength)
    out = jnp.dot(m.astype(wu_ref.dtype), wu_ref[...],
                  preferred_element_type=jnp.float32) + bu_ref[...]
    o_ref[...] = (out * scale_ref[0]).astype(o_ref.dtype)


def _pick_row_tile(seq_len, target):
    """Largest multiple of 256 (then 128, ... 8) <= target that divides seq_len."""
    cap = max(1, min(seq_len, target))
    for quant in (256, 128, 64, 32, 16, 8):
        t = (cap // quant) * quant
        while t >= quant:
            if seq_len % t == 0:
                return t
            t -= quant
    return seq_len   # seq_len not a multiple of 8: full-dim block is still legal


# ---------------------------------------------------------------------------
# Per-step hot path (everything else is prepared once and cached)
# ---------------------------------------------------------------------------
def lllite_apply(x, prep, strength, tk_strength, *, row_tile=512):
    """x: (B, S, in_dim); prep: output of lllite_prepare -> (B, S, in_dim)."""
    B, S, in_dim = x.shape
    c_mid = prep["c_mid"]
    n_cond, s_c, mlp_dim = c_mid.shape
    assert s_c == S and B % n_cond == 0

    ts = _pick_row_tile(S, row_tile)
    if B * (S // ts) < 2:                       # keep >= 2 grid steps (v7x megacore)
        ts = _pick_row_tile(S, max(8, ts // 2))
    n_st = S // ts

    # mask(=1) * strength * tk_strength -> single SMEM scalar (works traced too)
    scale = (jnp.asarray(strength, jnp.float32)
             * jnp.asarray(tk_strength, jnp.float32)).reshape(1)

    if n_cond == 1:
        cmid_map = lambda b, st: (0, st, 0)
    else:
        cmid_map = lambda b, st: (b % n_cond, st, 0)   # batch-broadcast via index_map

    grid_spec = pltpu.PrefetchScalarGridSpec(
        num_scalar_prefetch=0,
        grid=(B, n_st),
        in_specs=[
            pl.BlockSpec(memory_space=pltpu.MemorySpace.SMEM),            # scale
            pl.BlockSpec((None, ts, in_dim), lambda b, st: (b, st, 0)),   # x tile
            pl.BlockSpec((None, ts, mlp_dim), cmid_map),                  # c_mid tile
            pl.BlockSpec((in_dim, mlp_dim), lambda b, st: (0, 0)),        # W_down
            pl.BlockSpec((1, mlp_dim),      lambda b, st: (0, 0)),        # b_down
            pl.BlockSpec((mlp_dim, mlp_dim), lambda b, st: (0, 0)),       # W_mid (h half)
            pl.BlockSpec((mlp_dim, in_dim), lambda b, st: (0, 0)),        # W_up
            pl.BlockSpec((1, in_dim),       lambda b, st: (0, 0)),        # b_up
        ],
        out_specs=pl.BlockSpec((None, ts, in_dim), lambda b, st: (b, st, 0)),
    )

    itemsize = jnp.dtype(x.dtype).itemsize
    w_itemsize = jnp.dtype(prep["wd"].dtype).itemsize
    flops = 2 * B * S * (in_dim * mlp_dim + mlp_dim * mlp_dim + mlp_dim * in_dim)
    bytes_accessed = (B * S * in_dim * itemsize * 2            # x in + out
                      + B * S * mlp_dim * 4                    # streamed c_mid
                      + (prep["wd"].size + prep["wmh"].size + prep["wu"].size) * w_itemsize
                      + (prep["bd"].size + prep["bu"].size) * 4)

    out = pl.pallas_call(
        _lllite_kernel,
        out_shape=jax.ShapeDtypeStruct((B, S, in_dim), x.dtype),
        grid_spec=grid_spec,
        compiler_params=pltpu.CompilerParams(
            dimension_semantics=("parallel", "parallel"),
            vmem_limit_bytes=32 * 1024 * 1024),
        cost_estimate=pl.CostEstimate(flops=flops, transcendentals=0,
                                      bytes_accessed=bytes_accessed),
    )(scale, x, c_mid, prep["wd"], prep["bd"], prep["wmh"], prep["wu"], prep["bu"])
    return out


# ---------------------------------------------------------------------------
# One-time (cached) cond path: conditioning1 convs + cond half of `mid`,
# plus weight casts.  Mirrors the module's self.cond_emb caching.
# ---------------------------------------------------------------------------
def conditioning1_depth1(cond_hint, params):
    dn = ("NCHW", "OIHW", "NCHW")
    y = lax.conv_general_dilated(cond_hint, params["c1_w"], (4, 4), "VALID",
                                 dimension_numbers=dn)
    y = jnp.maximum(y + params["c1_b"][None, :, None, None], 0.0)
    y = lax.conv_general_dilated(y, params["c2_w"], (2, 2), "VALID",
                                 dimension_numbers=dn)
    return y + params["c2_b"][None, :, None, None]


def lllite_prepare(params, cond_hint, compute_dtype=jnp.bfloat16):
    cx4 = conditioning1_depth1(cond_hint.astype(jnp.float32), params)
    n, c, hh, ww = cx4.shape
    cx = jnp.transpose(cx4.reshape(n, c, hh * ww), (0, 2, 1))          # (n, S, ce)
    # Hoisted cond-emb half of `mid`: c_mid = cx @ W_mid[:ce] + b_mid  (kept f32)
    c_mid = jnp.einsum("nsc,cm->nsm", cx, params["w_mid_cx"]) + params["b_mid"]
    cd = compute_dtype
    return {
        "c_mid": c_mid.astype(jnp.float32),
        "wd": params["w_down"].astype(cd),
        "bd": params["b_down"].reshape(1, -1).astype(jnp.float32),
        "wmh": params["w_mid_h"].astype(cd),
        "wu": params["w_up"].astype(cd),
        "bu": params["b_up"].reshape(1, -1).astype(jnp.float32),
    }


def lllite_forward(x, cond_hint, params, strength, tk_strength, *,
                   row_tile=512, compute_dtype=jnp.bfloat16):
    """Convenience wrapper (real callers should cache lllite_prepare())."""
    prep = lllite_prepare(params, cond_hint, compute_dtype)
    return lllite_apply(x, prep, strength, tk_strength, row_tile=row_tile)


# ---------------------------------------------------------------------------
# Parameter init (deterministic, synthetic)
# ---------------------------------------------------------------------------
def init_params(key, in_dim, cond_emb_dim, mlp_dim):
    ks = jax.random.split(key, 10)
    s = 0.05
    ce2 = cond_emb_dim // 2
    return {
        # conditioning1 (depth=1)
        "c1_w": s * jax.random.normal(ks[0], (ce2, 3, 4, 4), jnp.float32),
        "c1_b": s * jax.random.normal(ks[1], (ce2,), jnp.float32),
        "c2_w": s * jax.random.normal(ks[2], (cond_emb_dim, ce2, 2, 2), jnp.float32),
        "c2_b": s * jax.random.normal(ks[3], (cond_emb_dim,), jnp.float32),
        # Linear weights stored as (in, out), i.e. W.T of torch
        "w_down": s * jax.random.normal(ks[4], (in_dim, mlp_dim), jnp.float32),
        "b_down": s * jax.random.normal(ks[5], (mlp_dim,), jnp.float32),
        # mid weight split: rows [0, ce) act on cond_emb, rows [ce, ce+mlp) on down(x)
        "w_mid_cx": s * jax.random.normal(ks[6], (cond_emb_dim, mlp_dim), jnp.float32),
        "w_mid_h": s * jax.random.normal(ks[7], (mlp_dim, mlp_dim), jnp.float32),
        "b_mid": s * jax.random.normal(ks[8], (mlp_dim,), jnp.float32),
        "w_up": s * jax.random.normal(ks[9], (mlp_dim, in_dim), jnp.float32),
        "b_up": jnp.zeros((in_dim,), jnp.float32),
    }


# ---------------------------------------------------------------------------
# References
# ---------------------------------------------------------------------------
def lllite_forward_ref_f32(x, cond_hint, params, strength, tk_strength):
    """Original-module math (cat + full mid weight), all in f32."""
    B, S, _ = x.shape
    cx4 = conditioning1_depth1(cond_hint.astype(jnp.float32), params)
    n, c, hh, ww = cx4.shape
    cx = jnp.transpose(cx4.reshape(n, c, hh * ww), (0, 2, 1))
    if B != n:
        cx = jnp.tile(cx, (B // n, 1, 1))
    xf = x.astype(jnp.float32)
    h = jnp.maximum(jnp.einsum("bsd,dm->bsm", xf, params["w_down"])
                    + params["b_down"], 0.0)
    cat = jnp.concatenate([cx, h], axis=2)
    w_mid = jnp.concatenate([params["w_mid_cx"], params["w_mid_h"]], axis=0)
    m = jnp.maximum(jnp.einsum("bsd,dm->bsm", cat, w_mid) + params["b_mid"], 0.0)
    up = jnp.einsum("bsm,md->bsd", m, params["w_up"]) + params["b_up"]
    return up * 1.0 * strength * tk_strength   # mask == 1.0


def lllite_forward_ref_cast(x, cond_hint, params, strength, tk_strength,
                            compute_dtype=jnp.bfloat16):
    """Same hoist/split/cast pipeline as the Pallas path (tight check)."""
    B, S, _ = x.shape
    cx4 = conditioning1_depth1(cond_hint.astype(jnp.float32), params)
    n, c, hh, ww = cx4.shape
    cx = jnp.transpose(cx4.reshape(n, c, hh * ww), (0, 2, 1))
    c_mid = jnp.einsum("nsc,cm->nsm", cx, params["w_mid_cx"]) + params["b_mid"]
    if B != n:
        c_mid = jnp.tile(c_mid, (B // n, 1, 1))
    cd = compute_dtype
    wd = params["w_down"].astype(cd)
    wmh = params["w_mid_h"].astype(cd)
    wu = params["w_up"].astype(cd)
    h = jnp.maximum(
        jnp.einsum("bsd,dm->bsm", x.astype(cd), wd,
                   preferred_element_type=jnp.float32)
        + params["b_down"].astype(jnp.float32), 0.0)
    m = jnp.maximum(
        jnp.einsum("bsm,mn->bsn", h.astype(cd), wmh,
                   preferred_element_type=jnp.float32)
        + c_mid.astype(jnp.float32), 0.0)
    up = jnp.einsum("bsm,md->bsd", m.astype(cd), wu,
                    preferred_element_type=jnp.float32) \
        + params["b_up"].astype(jnp.float32)
    scale = jnp.float32(strength) * jnp.float32(tk_strength)
    return (up * scale).astype(x.dtype)


if __name__ == "__main__":
    # Small config: is_conv2d=False, depth=1, in_dim=32, cond_emb_dim=16, mlp_dim=16
    in_dim, cond_emb_dim, mlp_dim = 32, 16, 16
    B = 2
    H = W = 128          # cond hint spatial; depth=1 => /8 => 16x16 => S=256 tokens
    S = (H // 8) * (W // 8)

    key = jax.random.PRNGKey(0)
    kp, kx, kh = jax.random.split(key, 3)
    params = init_params(kp, in_dim, cond_emb_dim, mlp_dim)

    x = jax.random.normal(kx, (B, S, in_dim), jnp.float32).astype(jnp.bfloat16)
    cond_hint = jax.random.normal(kh, (1, 3, H, W), jnp.float32)
    strength, tk_strength = 0.75, 0.9

    # One-time cond/weight prep (cached across denoising steps in real use)...
    prep = lllite_prepare(params, cond_hint, compute_dtype=jnp.bfloat16)
    # ... then the per-step hot path.
    out = lllite_apply(x, prep, strength, tk_strength, row_tile=512)
    out = jax.block_until_ready(out)

    assert out.shape == (B, S, in_dim)
    assert out.dtype == x.dtype

    out32 = out.astype(jnp.float32)
    ref_cast = lllite_forward_ref_cast(x, cond_hint, params, strength,
                                       tk_strength).astype(jnp.float32)
    ref_f32 = lllite_forward_ref_f32(x, cond_hint, params, strength, tk_strength)

    # Tight check vs. an identical-pipeline reference (validates split-mid /
    # hoist / index-map broadcast decomposition).
    assert jnp.allclose(out32, ref_cast, atol=2e-4, rtol=2e-3), \
        float(jnp.max(jnp.abs(out32 - ref_cast)))
    # Looser check vs. the original all-f32 module semantics (bf16 I/O error).
    assert jnp.allclose(out32, ref_f32, atol=3e-3, rtol=5e-2), \
        float(jnp.max(jnp.abs(out32 - ref_f32)))

    print("KERNEL_OK")
</pallas_src>

<mosaic_0001>
module attributes {stable_mosaic.version = 11 : i64} {
  func.func @_lllite_kernel(%arg0: i32, %arg1: i32, %arg2: memref<1xf32, #tpu.memory_space<smem>>, %arg3: memref<1x256x32xbf16, #tpu.memory_space<vmem>>, %arg4: memref<1x256x16xf32, #tpu.memory_space<vmem>>, %arg5: memref<32x16xbf16, #tpu.memory_space<vmem>>, %arg6: memref<1x16xf32, #tpu.memory_space<vmem>>, %arg7: memref<16x16xbf16, #tpu.memory_space<vmem>>, %arg8: memref<16x32xbf16, #tpu.memory_space<vmem>>, %arg9: memref<1x32xf32, #tpu.memory_space<vmem>>, %arg10: memref<1x256x32xbf16, #tpu.memory_space<vmem>>) attributes {dimension_semantics = [#tpu.dimension_semantics<parallel>, #tpu.dimension_semantics<parallel>], iteration_bounds = array<i64: 2, 1>, scalar_prefetch = 0 : i64, scratch_operands = 0 : i64, tpu.core_type = #tpu.core_type<tc>, window_params = [{transform_indices = @transform_0, window_bounds = array<i64: 1>}, {transform_indices = @transform_1, window_bounds = array<i64: 1, 256, 32>}, {transform_indices = @transform_2, window_bounds = array<i64: 1, 256, 16>}, {pipeline_mode = #tpu.pipeline_mode<synchronous>, transform_indices = @transform_3, window_bounds = array<i64: 32, 16>}, {pipeline_mode = #tpu.pipeline_mode<synchronous>, transform_indices = @transform_4, window_bounds = array<i64: 1, 16>}, {pipeline_mode = #tpu.pipeline_mode<synchronous>, transform_indices = @transform_5, window_bounds = array<i64: 16, 16>}, {pipeline_mode = #tpu.pipeline_mode<synchronous>, transform_indices = @transform_6, window_bounds = array<i64: 16, 32>}, {pipeline_mode = #tpu.pipeline_mode<synchronous>, transform_indices = @transform_7, window_bounds = array<i64: 1, 32>}, {transform_indices = @transform_8, window_bounds = array<i64: 1, 256, 32>}]} {
    %c0 = arith.constant 0 : index
    %c0_0 = arith.constant 0 : index
    %c0_1 = arith.constant 0 : index
    %0 = vector.load %arg3[%c0, %c0_0, %c0_1] : memref<1x256x32xbf16, #tpu.memory_space<vmem>>, vector<1x256x32xbf16>
    %1 = vector.shape_cast %0 : vector<1x256x32xbf16> to vector<256x32xbf16>
    %c0_2 = arith.constant 0 : index
    %c0_3 = arith.constant 0 : index
    %2 = vector.load %arg5[%c0_2, %c0_3] : memref<32x16xbf16, #tpu.memory_space<vmem>>, vector<32x16xbf16>
    %cst = arith.constant dense<0.000000e+00> : vector<256x16xf32>
    %3 = tpu.matmul %1, %2, %cst {dimension_numbers = #tpu.dot_dimension_numbers<[1], [0], [0], [1], [0, 0, 1, 1], [], []>} : vector<256x32xbf16>, vector<32x16xbf16>, vector<256x16xf32> -> vector<256x16xf32>
    %c0_4 = arith.constant 0 : index
    %c0_5 = arith.constant 0 : index
    %4 = vector.load %arg6[%c0_4, %c0_5] : memref<1x16xf32, #tpu.memory_space<vmem>>, vector<1x16xf32>
    %5 = vector.broadcast %4 : vector<1x16xf32> to vector<256x16xf32>
    %6 = arith.addf %3, %5 : vector<256x16xf32>
    %cst_6 = arith.constant 0.000000e+00 : f32
    %7 = vector.broadcast %cst_6 : f32 to vector<256x16xf32>
    %8 = arith.maximumf %6, %7 : vector<256x16xf32>
    %9 = arith.truncf %8 : vector<256x16xf32> to vector<256x16xbf16>
    %c0_7 = arith.constant 0 : index
    %c0_8 = arith.constant 0 : index
    %10 = vector.load %arg7[%c0_7, %c0_8] : memref<16x16xbf16, #tpu.memory_space<vmem>>, vector<16x16xbf16>
    %cst_9 = arith.constant dense<0.000000e+00> : vector<256x16xf32>
    %11 = tpu.matmul %9, %10, %cst_9 {dimension_numbers = #tpu.dot_dimension_numbers<[1], [0], [0], [1], [0, 0, 1, 1], [], []>} : vector<256x16xbf16>, vector<16x16xbf16>, vector<256x16xf32> -> vector<256x16xf32>
    %c0_10 = arith.constant 0 : index
    %c0_11 = arith.constant 0 : index
    %c0_12 = arith.constant 0 : index
    %12 = vector.load %arg4[%c0_10, %c0_11, %c0_12] : memref<1x256x16xf32, #tpu.memory_space<vmem>>, vector<1x256x16xf32>
    %13 = vector.shape_cast %12 : vector<1x256x16xf32> to vector<256x16xf32>
    %14 = arith.addf %11, %13 : vector<256x16xf32>
    %cst_13 = arith.constant 0.000000e+00 : f32
    %15 = vector.broadcast %cst_13 : f32 to vector<256x16xf32>
    %16 = arith.maximumf %14, %15 : vector<256x16xf32>
    %17 = arith.truncf %16 : vector<256x16xf32> to vector<256x16xbf16>
    %c0_14 = arith.constant 0 : index
    %c0_15 = arith.constant 0 : index
    %18 = vector.load %arg8[%c0_14, %c0_15] : memref<16x32xbf16, #tpu.memory_space<vmem>>, vector<16x32xbf16>
    %cst_16 = arith.constant dense<0.000000e+00> : vector<256x32xf32>
    %19 = tpu.matmul %17, %18, %cst_16 {dimension_numbers = #tpu.dot_dimension_numbers<[1], [0], [0], [1], [0, 0, 1, 1], [], []>} : vector<256x16xbf16>, vector<16x32xbf16>, vector<256x32xf32> -> vector<256x32xf32>
    %c0_17 = arith.constant 0 : index
    %c0_18 = arith.constant 0 : index
    %20 = vector.load %arg9[%c0_17, %c0_18] : memref<1x32xf32, #tpu.memory_space<vmem>>, vector<1x32xf32>
    %21 = vector.broadcast %20 : vector<1x32xf32> to vector<256x32xf32>
    %22 = arith.addf %19, %21 : vector<256x32xf32>
    %c0_19 = arith.constant 0 : index
    %23 = memref.load %arg2[%c0_19] : memref<1xf32, #tpu.memory_space<smem>>
    %24 = vector.broadcast %23 : f32 to vector<256x32xf32>
    %25 = arith.mulf %22, %24 : vector<256x32xf32>
    %26 = arith.truncf %25 : vector<256x32xf32> to vector<256x32xbf16>
    %c0_20 = arith.constant 0 : index
    %c0_21 = arith.constant 0 : index
    %c0_22 = arith.constant 0 : index
    %27 = vector.load %arg10[%c0_20, %c0_21, %c0_22] : memref<1x256x32xbf16, #tpu.memory_space<vmem>>, vector<1x256x32xbf16>
    %28 = vector.shape_cast %27 : vector<1x256x32xbf16> to vector<256x32xbf16>
    %29 = vector.shape_cast %26 : vector<256x32xbf16> to vector<1x256x32xbf16>
    tpu.vector_store %arg10[%c0_20, %c0_21, %c0_22], %29 {strides = array<i32>} : memref<1x256x32xbf16, #tpu.memory_space<vmem>>, vector<1x256x32xbf16>,
    return
  }
  func.func @transform_0(%arg0: i32, %arg1: i32) -> i32 {
    %c0_i32 = arith.constant 0 : i32
    %c0_i32_0 = arith.constant 0 : i32
    return %c0_i32 : i32
  }
  func.func @transform_1(%arg0: i32, %arg1: i32) -> (i32, i32, i32) {
    %c0_i32 = arith.constant 0 : i32
    %c0_i32_0 = arith.constant 0 : i32
    return %arg0, %arg1, %c0_i32 : i32, i32, i32
  }
  func.func @transform_2(%arg0: i32, %arg1: i32) -> (i32, i32, i32) {
    %c0_i32 = arith.constant 0 : i32
    %c0_i32_0 = arith.constant 0 : i32
    %c0_i32_1 = arith.constant 0 : i32
    return %c0_i32, %arg1, %c0_i32_0 : i32, i32, i32
  }
  func.func @transform_3(%arg0: i32, %arg1: i32) -> (i32, i32) {
    %c0_i32 = arith.constant 0 : i32
    %c0_i32_0 = arith.constant 0 : i32
    %c0_i32_1 = arith.constant 0 : i32
    return %c0_i32, %c0_i32_0 : i32, i32
  }
  func.func @transform_4(%arg0: i32, %arg1: i32) -> (i32, i32) {
    %c0_i32 = arith.constant 0 : i32
    %c0_i32_0 = arith.constant 0 : i32
    %c0_i32_1 = arith.constant 0 : i32
    return %c0_i32, %c0_i32_0 : i32, i32
  }
  func.func @transform_5(%arg0: i32, %arg1: i32) -> (i32, i32) {
    %c0_i32 = arith.constant 0 : i32
    %c0_i32_0 = arith.constant 0 : i32
    %c0_i32_1 = arith.constant 0 : i32
    return %c0_i32, %c0_i32_0 : i32, i32
  }
  func.func @transform_6(%arg0: i32, %arg1: i32) -> (i32, i32) {
    %c0_i32 = arith.constant 0 : i32
    %c0_i32_0 = arith.constant 0 : i32
    %c0_i32_1 = arith.constant 0 : i32
    return %c0_i32, %c0_i32_0 : i32, i32
  }
  func.func @transform_7(%arg0: i32, %arg1: i32) -> (i32, i32) {
    %c0_i32 = arith.constant 0 : i32
    %c0_i32_0 = arith.constant 0 : i32
    %c0_i32_1 = arith.constant 0 : i32
    return %c0_i32, %c0_i32_0 : i32, i32
  }
  func.func @transform_8(%arg0: i32, %arg1: i32) -> (i32, i32, i32) {
    %c0_i32 = arith.constant 0 : i32
    %c0_i32_0 = arith.constant 0 : i32
    return %arg0, %arg1, %c0_i32 : i32, i32, i32
  }
}

</mosaic_0001>

<bundles_post_ra>
// kernel: tpu_custom_call.1
= control target key start
LH: loop header
LB: loop body
LE: loop exit
PB: predicated region body
PF: predicated region fallthrough
CT: control target
= control target key end

     0   :  { %s1527_s29 = smov 0   ;;  %s1529_s30 = smov 0   ;;  %s1918_s0 = inlined_call_operand.<no memory space> [shape: f32[1], index: 0, kind: input, shape index: {}]   ;;  %s1919_s1 = inlined_call_operand.vmem [shape: bf16[2,256,32], index: 1, kind: input, shape index: {}]   ;;  %s1920_s2 = inlined_call_operand.vmem [shape: f32[1,256,16], index: 2, kind: input, shape index: {}]   ;;  %s1921_s3 = inlined_call_operand.vmem [shape: bf16[32,16], index: 3, kind: input, shape index: {}]   ;;  %s1922_s4 = inlined_call_operand.vmem [shape: f32[1,16], index: 4, kind: input, shape index: {}]   ;;  %s1923_s5 = inlined_call_operand.vmem [shape: bf16[16,16], index: 5, kind: input, shape index: {}]   ;;  %s1924_s6 = inlined_call_operand.vmem [shape: bf16[16,32], index: 6, kind: input, shape index: {}]   ;;  %s1925_s7 = inlined_call_operand.vmem [shape: f32[1,32], index: 7, kind: input, shape index: {}]   ;;  %s1926_s8 = inlined_call_operand.vmem [shape: bf16[2,256,32], index: 8, kind: output, shape index: {}]  }
   0x1   :  { %13 = sst [smem:[#allocation2]] %s1918_s0  ;;  %s1531_s9 = smov 0  }
   0x2 LB: > { %s31_s0 = sadd.s32 1, %s1473_s30  ;;  %p1268_p0 = scmp.ge.s32.totalorder %s1477_s9, 1  ;;  %s1477_s9 = sphi %s1531_s9, %s19_s9   ;;  %s1473_s30 = sphi %s1529_s30, %s1928_s30   ;;  %s1469_s29 = sphi %s1527_s29, %s1927_s29  }
   0x3   : > { %p33_p1 = scmp.ge.s32.totalorder %s31_s0, 2  ;;  %p295_p2 = scmp.lt.s32.totalorder %s1477_s9, 3 }
   0x5   : > { %s1930_s0 = smov (%p33_p1, %s31_s0), 0  ;;  %p296_p3 = pnand %p1268_p0, %p295_p2 }
   0x6   : > { %p343_p4 = scmp.lt.s32.totalorder (!%p296_p3), %s1469_s29, 1  ;;  %s1062_s13 = sld [smem:[#allocation2]] (!%p296_p3) }
   0x7   : > { %299 = sbr.rel (%p296_p3) target bundleno = 639 (0x27f), region = 52 }
   0xc   : > { %v1422_v0 = vld [vmem:[%s1921_s3 + $0x8] sm:$0xff]  ;;  %v1421_v1 = vld [vmem:[%s1921_s3] sm:$0xff]  ;;  %s1932_s29 = smov (!%p343_p4, %s1469_s29), 1  ;;  %vm501_vm0 = vcmask 261120   ;;  %vm727_vm1 = vcmask 130048   ;;  %vm1128_vm2 = vcmask 257024  }
   0xd   : > { %556 = vmatpush.bf16.msra.mxu0 %v1422_v0  ;;  %1425 = vmatpush.bf16.msra.mxu3 %v1422_v0  ;;  %s1403_s14 = sshll.u32 %s1932_s29, 7  ;;  %v1423_v11 = vld [vmem:[%s1923_s5] sm:$0xff] }
   0xe   : > { %s1559_s17 = scalar_lea.vmem %s1919_s1, %s1403_s14  ;;  %783 = vmatpush.bf16.msra.mxu1 %v1423_v11  ;;  %v1592_v17 = vld [vmem:[%s1922_s4] ss:$0 sm:$0xff]  ;;  %s1755_s25 = scalar_lea.vmem %s1926_s8, %s1403_s14 }
   0xf   : > { %v1405_v2 = vld [vmem:[%s1559_s17] sm:$0xff]  ;;  %v1406_v3 = vld [vmem:[%s1559_s17 + $0x8] sm:$0xff]  ;;  %v1407_v4 = vld [vmem:[%s1559_s17 + $0x10] sm:$0xff] }
  0x10   : > { %v1408_v5 = vld [vmem:[%s1559_s17 + $0x18] sm:$0xff]  ;;  %v1409_v6 = vld [vmem:[%s1559_s17 + $0x20] sm:$0xff]  ;;  %v1410_v8 = vld [vmem:[%s1559_s17 + $0x28] sm:$0xff] }
  0x11   : > { %557 = vmatpush.bf16.msra.mxu0 %v1421_v1  ;;  %1426 = vmatpush.bf16.msra.mxu3 %v1421_v1  ;;  %v1417_v7 = vld [vmem:[%s1559_s17 + $0x60] sm:$0xff]  ;;  %v1418_v9 = vld [vmem:[%s1559_s17 + $0x68] sm:$0xff]  ;;  %v1411_v10 = vld [vmem:[%s1559_s17 + $0x30] sm:$0xff] }
  0x12   : > { %v1419_v12 = vld [vmem:[%s1559_s17 + $0x70] sm:$0xff]  ;;  %v1412_v13 = vld [vmem:[%s1559_s17 + $0x38] sm:$0xff]  ;;  %v1413_v15 = vld [vmem:[%s1559_s17 + $0x40] sm:$0xff] }
  0x13   : > { %v1420_v14 = vld [vmem:[%s1559_s17 + $0x78] sm:$0xff]  ;;  %v1414_v24 = vld [vmem:[%s1559_s17 + $0x48] sm:$0xff]  ;;  %v1415_v32 = vld [vmem:[%s1559_s17 + $0x50] sm:$0xff] }
  0x14   : > { %1345 = vmatmul.msk.bf16.vlgmr.msra.gmra.mxu0 %vm501_vm0, %v1405_v2  ;;  %1357 = vmatmul.msk.bf16.vlgmr.msra.gmra.mxu3 %vm501_vm0, %v1417_v7  ;;  %v1416_v40 = vld [vmem:[%s1559_s17 + $0x58] sm:$0xff] }
  0x15   : > { %1427 = vmatpush.bf16.msrb.mxu3 %v1423_v11 }
  0x24   : > { %1346 = vmatmul.msk.bf16.gmra.mxu0 %vm501_vm0, %v1406_v3  ;;  %1358 = vmatmul.msk.bf16.gmra.mxu3 %vm501_vm0, %v1418_v9 }
  0x34   : > { %1347 = vmatmul.msk.bf16.gmra.mxu0 %vm501_vm0, %v1407_v4  ;;  %1359 = vmatmul.msk.bf16.gmra.mxu3 %vm501_vm0, %v1419_v12 }
  0x44   : > { %1348 = vmatmul.msk.bf16.gmra.mxu0 %vm501_vm0, %v1408_v5  ;;  %1360 = vmatmul.msk.bf16.gmra.mxu3 %vm501_vm0, %v1420_v14 }
  0x54   : > { %1349 = vmatmul.msk.bf16.gmra.mxu0 %vm501_vm0, %v1409_v6 }
  0x64   : > { %1350 = vmatmul.msk.bf16.gmra.mxu0 %vm501_vm0, %v1410_v8 }
  0x74   : > { %1351 = vmatmul.msk.bf16.gmra.mxu0 %vm501_vm0, %v1411_v10 }
  0x84   : > { %1352 = vmatmul.msk.bf16.gmra.mxu0 %vm501_vm0, %v1412_v13 }
  0x91   : > { %v559_v16 = vpop.f32.mrf.mxu0 }
  0x92   : > { %v560_v18 = vadd.f32 %v1592_v17, %v559_v16 }
  0x94   : > { %1353 = vmatmul.msk.bf16.gmra.mxu0 %vm501_vm0, %v1413_v15  ;;  %v639_v21 = vmax.f32 %v560_v18, 0.0 }
  0x97   : > { %v619_v56 = vpop.f32.mrf.mxu3 }
  0x98   : > { %v620_v60 = vadd.f32 %v1592_v17, %v619_v56 }
  0x99   : > { %v561_v19 = vpop.f32.mrf.mxu0 }
  0x9a   : > { %v562_v20 = vadd.f32 %v1592_v17, %v561_v19  ;;  %v663_v1 = vmax.f32 %v620_v60, 0.0 }
  0x9c   : > { %v640_v22 = vmax.f32 %v562_v20, 0.0 }
  0x9e   : > { %v671_v23 = vpack.c.bf16 %v640_v22, %v639_v21  ;;  %v1424_v22 = vld [vmem:[%s1924_s6] sm:$0xff] }
  0x9f   : > { %v621_v61 = vpop.f32.mrf.mxu3  ;;  %980 = vmatpush.bf16.msra.mxu2 %v1424_v22  ;;  %1428 = vmatpush.bf16.msra.mxu3 %v1424_v22  ;;  %v694_v22 = vld [vmem:[%s1920_s2 + $0x28] sm:$0xff] }
  0xa0   : > { %1365 = vmatmul.msk.bf16.vlgmr.msra.gmra.mxu1 %vm727_vm1, %v671_v23  ;;  %v622_v2 = vadd.f32 %v1592_v17, %v621_v61 }
  0xa1   : > { %v564_v25 = vpop.f32.mrf.mxu0 }
  0xa2   : > { %v565_v26 = vadd.f32 %v1592_v17, %v564_v25  ;;  %v664_v3 = vmax.f32 %v622_v2, 0.0  ;;  %v691_v2 = vld [vmem:[%s1920_s2 + $0x10] sm:$0xff] }
  0xa4   : > { %1354 = vmatmul.msk.bf16.gmra.mxu0 %vm501_vm0, %v1414_v24  ;;  %v641_v29 = vmax.f32 %v565_v26, 0.0  ;;  %v1621_v5 = vpack.c.bf16 %v664_v3, %v663_v1 }
  0xa7   : > { %v624_v6 = vpop.f32.mrf.mxu3 }
  0xa8   : > { %v625_v8 = vadd.f32 %v1592_v17, %v624_v6 }
  0xa9   : > { %v566_v27 = vpop.f32.mrf.mxu0 }
  0xaa   : > { %v567_v28 = vadd.f32 %v1592_v17, %v566_v27  ;;  %v665_v14 = vmax.f32 %v625_v8, 0.0 }
  0xac   : > { %v642_v30 = vmax.f32 %v567_v28, 0.0 }
  0xae   : > { %v672_v31 = vpack.c.bf16 %v642_v30, %v641_v29 }
  0xaf   : > { %v626_v11 = vpop.f32.mrf.mxu3 }
  0xb0   : > { %1366 = vmatmul.msk.bf16.gmra.mxu1 %vm727_vm1, %v672_v31  ;;  %v627_v15 = vadd.f32 %v1592_v17, %v626_v11 }
  0xb1   : > { %v569_v33 = vpop.f32.mrf.mxu0 }
  0xb2   : > { %v570_v34 = vadd.f32 %v1592_v17, %v569_v33  ;;  %v666_v18 = vmax.f32 %v627_v15, 0.0 }
  0xb4   : > { %1355 = vmatmul.msk.bf16.gmra.mxu0 %vm501_vm0, %v1415_v32  ;;  %v643_v37 = vmax.f32 %v570_v34, 0.0  ;;  %v684_v19 = vpack.c.bf16 %v666_v18, %v665_v14 }
  0xb6   : > { %1378 = vmatmul.msk.bf16.vlgmr.msrb.gmra.mxu3 %vm727_vm1, %v684_v19 }
  0xb7   : > { %v629_v21 = vpop.f32.mrf.mxu3 }
  0xb8   : > { %v630_v24 = vadd.f32 %v1592_v17, %v629_v21 }
  0xb9   : > { %v571_v35 = vpop.f32.mrf.mxu0 }
  0xba   : > { %v572_v36 = vadd.f32 %v1592_v17, %v571_v35  ;;  %v667_v30 = vmax.f32 %v630_v24, 0.0 }
  0xbc   : > { %v644_v38 = vmax.f32 %v572_v36, 0.0 }
  0xbe   : > { %v673_v39 = vpack.c.bf16 %v644_v38, %v643_v37 }
  0xbf   : > { %v631_v27 = vpop.f32.mrf.mxu3 }
  0xc0   : > { %1367 = vmatmul.msk.bf16.gmra.mxu1 %vm727_vm1, %v673_v39  ;;  %v632_v31 = vadd.f32 %v1592_v17, %v631_v27 }
  0xc1   : > { %v574_v41 = vpop.f32.mrf.mxu0 }
  0xc2   : > { %v575_v42 = vadd.f32 %v1592_v17, %v574_v41  ;;  %v668_v33 = vmax.f32 %v632_v31, 0.0 }
  0xc4   : > { %1356 = vmatmul.msk.bf16.gmra.mxu0 %vm501_vm0, %v1416_v40  ;;  %v645_v45 = vmax.f32 %v575_v42, 0.0  ;;  %v685_v34 = vpack.c.bf16 %v668_v33, %v667_v30 }
  0xc6   : > { %1379 = vmatmul.msk.bf16.gmra.mxu3 %vm727_vm1, %v685_v34 }
  0xc7   : > { %v634_v36 = vpop.f32.mrf.mxu3 }
  0xc8   : > { %v635_v38 = vadd.f32 %v1592_v17, %v634_v36  ;;  %v695_v36 = vld [vmem:[%s1920_s2 + $0x30] sm:$0xff] }
  0xc9   : > { %v576_v43 = vpop.f32.mrf.mxu0 }
  0xca   : > { %v577_v44 = vadd.f32 %v1592_v17, %v576_v43 }
  0xcc   : > { %v646_v46 = vmax.f32 %v577_v44, 0.0  ;;  %v669_v44 = vmax.f32 %v635_v38, 0.0 }
  0xce   : > { %v674_v47 = vpack.c.bf16 %v646_v46, %v645_v45 }
  0xcf   : > { %v636_v41 = vpop.f32.mrf.mxu3 }
  0xd0   : > { %1368 = vmatmul.msk.bf16.gmra.mxu1 %vm727_vm1, %v674_v47  ;;  %v637_v45 = vadd.f32 %v1592_v17, %v636_v41 }
  0xd1   : > { %v579_v48 = vpop.f32.mrf.mxu0 }
  0xd2   : > { %v580_v49 = vadd.f32 %v1592_v17, %v579_v48  ;;  %v670_v48 = vmax.f32 %v637_v45, 0.0  ;;  %v698_v45 = vld [vmem:[%s1920_s2 + $0x48] sm:$0xff] }
  0xd4   : > { %v647_v52 = vmax.f32 %v580_v49, 0.0  ;;  %v686_v49 = vpack.c.bf16 %v670_v48, %v669_v44  ;;  %v697_v44 = vld [vmem:[%s1920_s2 + $0x40] sm:$0xff] }
  0xd6   : > { %1380 = vmatmul.msk.bf16.gmra.mxu3 %vm727_vm1, %v686_v49 }
  0xd9   : > { %v581_v50 = vpop.f32.mrf.mxu0 }
  0xda   : > { %v582_v51 = vadd.f32 %v1592_v17, %v581_v50  ;;  %v689_v50 = vld [vmem:[%s1920_s2] sm:$0xff] }
  0xdc   : > { %v648_v53 = vmax.f32 %v582_v51, 0.0 }
  0xde   : > { %v675_v54 = vpack.c.bf16 %v648_v53, %v647_v52  ;;  %v690_v52 = vld [vmem:[%s1920_s2 + $0x8] sm:$0xff] }
  0xe0   : > { %1369 = vmatmul.msk.bf16.gmra.mxu1 %vm727_vm1, %v675_v54 }
  0xe1   : > { %v584_v55 = vpop.f32.mrf.mxu0 }
  0xe2   : > { %v585_v57 = vadd.f32 %v1592_v17, %v584_v55 }
  0xe4   : > { %v649_v62 = vmax.f32 %v585_v57, 0.0 }
  0xe9   : > { %v586_v58 = vpop.f32.mrf.mxu0 }
  0xea   : > { %v587_v59 = vadd.f32 %v1592_v17, %v586_v58 }
  0xec   : > { %v650_v63 = vmax.f32 %v587_v59, 0.0 }
  0xee   : > { %v676_v0 = vpack.c.bf16 %v650_v63, %v649_v62 }
  0xf0   : > { %1370 = vmatmul.msk.bf16.gmra.mxu1 %vm727_vm1, %v676_v0 }
  0xf1   : > { %v589_v4 = vpop.f32.mrf.mxu0 }
  0xf2   : > { %v590_v7 = vadd.f32 %v1592_v17, %v589_v4  ;;  %v692_v4 = vld [vmem:[%s1920_s2 + $0x18] sm:$0xff] }
  0xf4   : > { %v651_v12 = vmax.f32 %v590_v7, 0.0 }
  0xf9   : > { %v591_v9 = vpop.f32.mrf.mxu0 }
  0xfa   : > { %v592_v10 = vadd.f32 %v1592_v17, %v591_v9 }
  0xfc   : > { %v652_v13 = vmax.f32 %v592_v10, 0.0 }
  0xfe   : > { %v677_v16 = vpack.c.bf16 %v652_v13, %v651_v12 }
 0x100   : > { %1371 = vmatmul.msk.bf16.gmra.mxu1 %vm727_vm1, %v677_v16 }
 0x101   : > { %v594_v20 = vpop.f32.mrf.mxu0 }
 0x102   : > { %v595_v23 = vadd.f32 %v1592_v17, %v594_v20  ;;  %v693_v20 = vld [vmem:[%s1920_s2 + $0x20] sm:$0xff] }
 0x104   : > { %v653_v28 = vmax.f32 %v595_v23, 0.0 }
 0x109   : > { %v596_v25 = vpop.f32.mrf.mxu0 }
 0x10a   : > { %v597_v26 = vadd.f32 %v1592_v17, %v596_v25 }
 0x10c   : > { %v654_v29 = vmax.f32 %v597_v26, 0.0 }
 0x10e   : > { %v678_v32 = vpack.c.bf16 %v654_v29, %v653_v28 }
 0x110   : > { %1372 = vmatmul.msk.bf16.gmra.mxu1 %vm727_vm1, %v678_v32 }
 0x111   : > { %v599_v35 = vpop.f32.mrf.mxu0 }
 0x112   : > { %v600_v37 = vadd.f32 %v1592_v17, %v599_v35 }
 0x114   : > { %v655_v42 = vmax.f32 %v600_v37, 0.0  ;;  %v696_v37 = vld [vmem:[%s1920_s2 + $0x38] sm:$0xff] }
 0x119   : > { %v601_v39 = vpop.f32.mrf.mxu0 }
 0x11a   : > { %v602_v40 = vadd.f32 %v1592_v17, %v601_v39 }
 0x11c   : > { %v656_v43 = vmax.f32 %v602_v40, 0.0 }
 0x11d   : > { %v785_v46 = vpop.f32.mrf.mxu1 }
 0x11e   : > { %v679_v47 = vpack.c.bf16 %v656_v43, %v655_v42  ;;  %v786_v53 = vadd.f32 %v785_v46, %v689_v50 }
 0x120   : > { %1373 = vmatmul.msk.bf16.gmra.mxu1 %vm727_vm1, %v679_v47  ;;  %v865_v56 = vmax.f32 %v786_v53, 0.0  ;;  %v700_v53 = vld [vmem:[%s1920_s2 + $0x58] sm:$0xff] }
 0x121   : > { %v604_v51 = vpop.f32.mrf.mxu0 }
 0x122   : > { %v605_v57 = vadd.f32 %v1592_v17, %v604_v51 }
 0x124   : > { %v657_v62 = vmax.f32 %v605_v57, 0.0 }
 0x125   : > { %v787_v54 = vpop.f32.mrf.mxu1 }
 0x126   : > { %v788_v55 = vadd.f32 %v787_v54, %v690_v52 }
 0x128   : > { %v866_v58 = vmax.f32 %v788_v55, 0.0 }
 0x129   : > { %v606_v59 = vpop.f32.mrf.mxu0 }
 0x12a   : > { %v607_v60 = vadd.f32 %v1592_v17, %v606_v59  ;;  %v897_v61 = vpack.c.bf16 %v866_v58, %v865_v56 }
 0x12c   : > { %v658_v63 = vmax.f32 %v607_v60, 0.0  ;;  %1385 = vmatmul.msk.bf16.vlgmr.msra.gmra.mxu2 %vm727_vm1, %v897_v61  ;;  %v701_v61 = vld [vmem:[%s1920_s2 + $0x60] sm:$0xff] }
 0x12d   : > { %v790_v0 = vpop.f32.mrf.mxu1 }
 0x12e   : > { %v680_v1 = vpack.c.bf16 %v658_v63, %v657_v62  ;;  %v791_v6 = vadd.f32 %v790_v0, %v691_v2  ;;  %v702_v62 = vld [vmem:[%s1920_s2 + $0x68] sm:$0xff] }
 0x130   : > { %1374 = vmatmul.msk.bf16.gmra.mxu1 %vm727_vm1, %v680_v1  ;;  %v867_v9 = vmax.f32 %v791_v6, 0.0 }
 0x131   : > { %v609_v3 = vpop.f32.mrf.mxu0 }
 0x132   : > { %v610_v10 = vadd.f32 %v1592_v17, %v609_v3 }
 0x134   : > { %v659_v15 = vmax.f32 %v610_v10, 0.0  ;;  %v716_v10 = vld [vmem:[%s1920_s2 + $0xd8] sm:$0xff] }
 0x135   : > { %v792_v7 = vpop.f32.mrf.mxu1 }
 0x136   : > { %v793_v8 = vadd.f32 %v792_v7, %v692_v4  ;;  %v715_v7 = vld [vmem:[%s1920_s2 + $0xd0] sm:$0xff] }
 0x138   : > { %v868_v11 = vmax.f32 %v793_v8, 0.0 }
 0x139   : > { %v611_v12 = vpop.f32.mrf.mxu0  ;;  %v850_v1 = vpop.f32.mrf.mxu3 }
 0x13a   : > { %v898_v13 = vpack.c.bf16 %v868_v11, %v867_v9  ;;  %v612_v14 = vadd.f32 %v1592_v17, %v611_v12  ;;  %v851_v8 = vadd.f32 %v850_v1, %v715_v7 }
 0x13c   : > { %v660_v16 = vmax.f32 %v612_v14, 0.0  ;;  %1386 = vmatmul.msk.bf16.gmra.mxu2 %vm727_vm1, %v898_v13  ;;  %v891_v12 = vmax.f32 %v851_v8, 0.0 }
 0x13d   : > { %v795_v18 = vpop.f32.mrf.mxu1 }
 0x13e   : > { %v681_v19 = vpack.c.bf16 %v660_v16, %v659_v15  ;;  %v796_v23 = vadd.f32 %v795_v18, %v693_v20  ;;  %v703_v15 = vld [vmem:[%s1920_s2 + $0x70] sm:$0xff]  ;;  %v704_v18 = vld [vmem:[%s1920_s2 + $0x78] sm:$0xff] }
 0x140   : > { %1375 = vmatmul.msk.bf16.gmra.mxu1 %vm727_vm1, %v681_v19  ;;  %v869_v26 = vmax.f32 %v796_v23, 0.0 }
 0x141   : > { %v614_v21 = vpop.f32.mrf.mxu0  ;;  %v852_v11 = vpop.f32.mrf.mxu3 }
 0x142   : > { %v615_v27 = vadd.f32 %v1592_v17, %v614_v21  ;;  %v853_v13 = vadd.f32 %v852_v11, %v716_v10  ;;  %v710_v11 = vld [vmem:[%s1920_s2 + $0xa8] sm:$0xff] }
 0x144   : > { %v661_v32 = vmax.f32 %v615_v27, 0.0  ;;  %v892_v14 = vmax.f32 %v853_v13, 0.0 }
 0x145   : > { %v797_v24 = vpop.f32.mrf.mxu1 }
 0x146   : > { %v798_v25 = vadd.f32 %v797_v24, %v694_v22  ;;  %v910_v16 = vpack.c.bf16 %v892_v14, %v891_v12 }
 0x148   : > { %v870_v28 = vmax.f32 %v798_v25, 0.0  ;;  %1398 = vmatmul.msk.bf16.vlgmr.msra.gmra.mxu3 %vm727_vm1, %v910_v16 }
 0x149   : > { %v616_v29 = vpop.f32.mrf.mxu0  ;;  %v855_v21 = vpop.f32.mrf.mxu3 }
 0x14a   : > { %v899_v30 = vpack.c.bf16 %v870_v28, %v869_v26  ;;  %v617_v31 = vadd.f32 %v1592_v17, %v616_v29  ;;  %v717_v26 = vld [vmem:[%s1920_s2 + $0xe0] sm:$0xff]  ;;  %v718_v29 = vld [vmem:[%s1920_s2 + $0xe8] sm:$0xff] }
 0x14b   : > { %v856_v27 = vadd.f32 %v855_v21, %v717_v26 }
 0x14c   : > { %v662_v33 = vmax.f32 %v617_v31, 0.0  ;;  %1387 = vmatmul.msk.bf16.gmra.mxu2 %vm727_vm1, %v899_v30 }
 0x14d   : > { %v800_v34 = vpop.f32.mrf.mxu1  ;;  %v893_v31 = vmax.f32 %v856_v27, 0.0  ;;  %v711_v27 = vld [vmem:[%s1920_s2 + $0xb0] sm:$0xff] }
 0x14e   : > { %v682_v35 = vpack.c.bf16 %v662_v33, %v661_v32  ;;  %v801_v38 = vadd.f32 %v800_v34, %v695_v36  ;;  %v705_v34 = vld [vmem:[%s1920_s2 + $0x80] sm:$0xff]  ;;  %v706_v36 = vld [vmem:[%s1920_s2 + $0x88] sm:$0xff] }
 0x150   : > { %1376 = vmatmul.msk.bf16.gmra.mxu1 %vm727_vm1, %v682_v35  ;;  %v871_v17 = vmax.f32 %v801_v38, 0.0 }
 0x151   : > { %v857_v30 = vpop.f32.mrf.mxu3 }
 0x152   : > { %v858_v32 = vadd.f32 %v857_v30, %v718_v29  ;;  %v712_v29 = vld [vmem:[%s1920_s2 + $0xb8] sm:$0xff] }
 0x154   : > { %v894_v33 = vmax.f32 %v858_v32, 0.0 }
 0x155   : > { %v802_v39 = vpop.f32.mrf.mxu1 }
 0x156   : > { %v803_v40 = vadd.f32 %v802_v39, %v696_v37  ;;  %v911_v35 = vpack.c.bf16 %v894_v33, %v893_v31 }
 0x158   : > { %v872_v41 = vmax.f32 %v803_v40, 0.0  ;;  %1399 = vmatmul.msk.bf16.gmra.mxu3 %vm727_vm1, %v911_v35 }
 0x159   : > { %v860_v39 = vpop.f32.mrf.mxu3 }
 0x15a   : > { %v900_v42 = vpack.c.bf16 %v872_v41, %v871_v17 }
 0x15c   : > { %1388 = vmatmul.msk.bf16.gmra.mxu2 %vm727_vm1, %v900_v42 }
 0x15d   : > { %v805_v43 = vpop.f32.mrf.mxu1 }
 0x15e   : > { %v806_v46 = vadd.f32 %v805_v43, %v697_v44  ;;  %v719_v43 = vld [vmem:[%s1920_s2 + $0xf0] sm:$0xff] }
 0x15f   : > { %v861_v44 = vadd.f32 %v860_v39, %v719_v43  ;;  %v713_v43 = vld [vmem:[%s1920_s2 + $0xc0] sm:$0xff] }
 0x160   : > { %1377 = vmatmul.msk.bf16.gmra.mxu1 %vm727_vm1, %v1621_v5  ;;  %v873_v49 = vmax.f32 %v806_v46, 0.0  ;;  %v699_v5 = vld [vmem:[%s1920_s2 + $0x50] sm:$0xff] }
 0x165   : > { %v807_v47 = vpop.f32.mrf.mxu1 }
 0x166   : > { %v808_v48 = vadd.f32 %v807_v47, %v698_v45  ;;  %v1738_v45 = vld [vmem:[%s1925_s7] ss:$0 sm:$0xff]  ;;  %v720_v47 = vld [vmem:[%s1920_s2 + $0xf8] sm:$0xff] }
 0x168   : > { %v874_v50 = vmax.f32 %v808_v48, 0.0  ;;  %v862_v48 = vpop.f32.mrf.mxu3 }
 0x16a   : > { %v901_v51 = vpack.c.bf16 %v874_v50, %v873_v49  ;;  %v895_v49 = vmax.f32 %v861_v44, 0.0  ;;  %v863_v50 = vadd.f32 %v862_v48, %v720_v47 }
 0x16c   : > { %1389 = vmatmul.msk.bf16.gmra.mxu2 %vm727_vm1, %v901_v51 }
 0x16d   : > { %v810_v52 = vpop.f32.mrf.mxu1 }
 0x16e   : > { %v811_v54 = vadd.f32 %v810_v52, %v699_v5  ;;  %v1743_v52 = vstv %s1062_s13 }
 0x170   : > { %v875_v57 = vmax.f32 %v811_v54, 0.0  ;;  %v707_v54 = vld [vmem:[%s1920_s2 + $0x90] sm:$0xff] }
 0x175   : > { %v812_v55 = vpop.f32.mrf.mxu1 }
 0x176   : > { %v813_v56 = vadd.f32 %v812_v55, %v700_v53  ;;  %v896_v53 = vmax.f32 %v863_v50, 0.0 }
 0x178   : > { %v876_v58 = vmax.f32 %v813_v56, 0.0  ;;  %v912_v56 = vpack.c.bf16 %v896_v53, %v895_v49 }
 0x17a   : > { %v902_v59 = vpack.c.bf16 %v876_v58, %v875_v57  ;;  %v708_v57 = vld [vmem:[%s1920_s2 + $0x98] sm:$0xff]  ;;  %1400 = vmatmul.msk.bf16.gmra.mxu3 %vm727_vm1, %v912_v56 }
 0x17c   : > { %1390 = vmatmul.msk.bf16.gmra.mxu2 %vm727_vm1, %v902_v59 }
 0x17d   : > { %v815_v60 = vpop.f32.mrf.mxu1 }
 0x17e   : > { %v816_v63 = vadd.f32 %v815_v60, %v701_v61 }
 0x180   : > { %v877_v3 = vmax.f32 %v816_v63, 0.0 }
 0x185   : > { %v817_v0 = vpop.f32.mrf.mxu1 }
 0x186   : > { %v818_v2 = vadd.f32 %v817_v0, %v702_v62 }
 0x188   : > { %v878_v4 = vmax.f32 %v818_v2, 0.0 }
 0x18a   : > { %v903_v6 = vpack.c.bf16 %v878_v4, %v877_v3 }
 0x18c   : > { %1391 = vmatmul.msk.bf16.gmra.mxu2 %vm727_vm1, %v903_v6 }
 0x18d   : > { %v820_v9 = vpop.f32.mrf.mxu1 }
 0x18e   : > { %v821_v19 = vadd.f32 %v820_v9, %v703_v15  ;;  %v709_v9 = vld [vmem:[%s1920_s2 + $0xa0] sm:$0xff] }
 0x190   : > { %v879_v23 = vmax.f32 %v821_v19, 0.0 }
 0x195   : > { %v822_v20 = vpop.f32.mrf.mxu1 }
 0x196   : > { %v823_v22 = vadd.f32 %v822_v20, %v704_v18 }
 0x198   : > { %v880_v24 = vmax.f32 %v823_v22, 0.0 }
 0x19a   : > { %v904_v25 = vpack.c.bf16 %v880_v24, %v879_v23 }
 0x19c   : > { %1392 = vmatmul.msk.bf16.gmra.mxu2 %vm727_vm1, %v904_v25 }
 0x19d   : > { %v825_v28 = vpop.f32.mrf.mxu1 }
 0x19e   : > { %v826_v37 = vadd.f32 %v825_v28, %v705_v34 }
 0x1a0   : > { %v881_v17 = vmax.f32 %v826_v37, 0.0 }
 0x1a5   : > { %v827_v38 = vpop.f32.mrf.mxu1 }
 0x1a6   : > { %v828_v40 = vadd.f32 %v827_v38, %v706_v36 }
 0x1a8   : > { %v882_v41 = vmax.f32 %v828_v40, 0.0 }
 0x1aa   : > { %v905_v42 = vpack.c.bf16 %v882_v41, %v881_v17 }
 0x1ac   : > { %1393 = vmatmul.msk.bf16.gmra.mxu2 %vm727_vm1, %v905_v42 }
 0x1ad   : > { %v830_v46 = vpop.f32.mrf.mxu1 }
 0x1ae   : > { %v831_v58 = vadd.f32 %v830_v46, %v707_v54  ;;  %v714_v46 = vld [vmem:[%s1920_s2 + $0xc8] sm:$0xff] }
 0x1af   : > { %v982_v51 = vpop.f32.mrf.mxu2 }
 0x1b0   : > { %v983_v5 = vadd.f32 %v1738_v45, %v982_v51  ;;  %v883_v63 = vmax.f32 %v831_v58, 0.0 }
 0x1b2   : > { %v1064_v55 = vmul.f32 %v1743_v52, %v983_v5 }
 0x1b4   : > { %v1096_v59 = vpack.c.bf16 %v1064_v55, %v1064_v55 }
 0x1b5   : > { %v832_v60 = vpop.f32.mrf.mxu1 }
 0x1b6   : > { %1129 = vst.msk [vmem:[%s1755_s25] sm:$0xf] %vm1128_vm2, %v1096_v59  ;;  %v833_v61 = vadd.f32 %v832_v60, %v708_v57 }
 0x1b7   : > { %v984_v62 = vpop.f32.mrf.mxu2 }
 0x1b8   : > { %v884_v0 = vmax.f32 %v833_v61, 0.0  ;;  %v985_v1 = vadd.f32 %v1738_v45, %v984_v62 }
 0x1ba   : > { %v906_v2 = vpack.c.bf16 %v884_v0, %v883_v63  ;;  %v1065_v3 = vmul.f32 %v1743_v52, %v985_v1 }
 0x1bc   : > { %v1097_v4 = vpack.c.bf16 %v1065_v3, %v1065_v3  ;;  %1394 = vmatmul.msk.bf16.gmra.mxu2 %vm727_vm1, %v906_v2 }
 0x1bd   : > { %v835_v6 = vpop.f32.mrf.mxu1 }
 0x1be   : > { %1130 = vst.msk [vmem:[%s1755_s25 + $0x4] sm:$0xf] %vm1128_vm2, %v1097_v4  ;;  %v836_v12 = vadd.f32 %v835_v6, %v709_v9 }
 0x1bf   : > { %v987_v7 = vpop.f32.mrf.mxu2 }
 0x1c0   : > { %v988_v8 = vadd.f32 %v1738_v45, %v987_v7  ;;  %v885_v18 = vmax.f32 %v836_v12, 0.0 }
 0x1c2   : > { %v1066_v10 = vmul.f32 %v1743_v52, %v988_v8 }
 0x1c4   : > { %v1098_v13 = vpack.c.bf16 %v1066_v10, %v1066_v10 }
 0x1c5   : > { %v837_v14 = vpop.f32.mrf.mxu1 }
 0x1c6   : > { %1131 = vst.msk [vmem:[%s1755_s25 + $0x8] sm:$0xf] %vm1128_vm2, %v1098_v13  ;;  %v838_v15 = vadd.f32 %v837_v14, %v710_v11 }
 0x1c7   : > { %v989_v16 = vpop.f32.mrf.mxu2 }
 0x1c8   : > { %v886_v19 = vmax.f32 %v838_v15, 0.0  ;;  %v990_v20 = vadd.f32 %v1738_v45, %v989_v16 }
 0x1ca   : > { %v907_v21 = vpack.c.bf16 %v886_v19, %v885_v18  ;;  %v1067_v22 = vmul.f32 %v1743_v52, %v990_v20 }
 0x1cb   : > { %v1047_v16 = vpop.f32.mrf.mxu3 }
 0x1cc   : > { %v1099_v23 = vpack.c.bf16 %v1067_v22, %v1067_v22  ;;  %1395 = vmatmul.msk.bf16.gmra.mxu2 %vm727_vm1, %v907_v21  ;;  %v1048_v21 = vadd.f32 %v1738_v45, %v1047_v16 }
 0x1cd   : > { %v840_v24 = vpop.f32.mrf.mxu1 }
 0x1ce   : > { %1132 = vst.msk [vmem:[%s1755_s25 + $0xc] sm:$0xf] %vm1128_vm2, %v1099_v23  ;;  %v841_v30 = vadd.f32 %v840_v24, %v711_v27 }
 0x1cf   : > { %v992_v25 = vpop.f32.mrf.mxu2 }
 0x1d0   : > { %v993_v26 = vadd.f32 %v1738_v45, %v992_v25  ;;  %v887_v35 = vmax.f32 %v841_v30, 0.0  ;;  %v1090_v25 = vmul.f32 %v1743_v52, %v1048_v21 }
 0x1d2   : > { %v1068_v28 = vmul.f32 %v1743_v52, %v993_v26 }
 0x1d3   : > { %v1049_v23 = vpop.f32.mrf.mxu3 }
 0x1d4   : > { %v1100_v31 = vpack.c.bf16 %v1068_v28, %v1068_v28  ;;  %v1050_v26 = vadd.f32 %v1738_v45, %v1049_v23  ;;  %v1122_v28 = vpack.c.bf16 %v1090_v25, %v1090_v25 }
 0x1d5   : > { %v842_v32 = vpop.f32.mrf.mxu1 }
 0x1d6   : > { %1133 = vst.msk [vmem:[%s1755_s25 + $0x10] sm:$0xf] %vm1128_vm2, %v1100_v31  ;;  %v843_v33 = vadd.f32 %v842_v32, %v712_v29  ;;  %v1091_v29 = vmul.f32 %v1743_v52, %v1050_v26 }
 0x1d7   : > { %v994_v34 = vpop.f32.mrf.mxu2  ;;  %1155 = vst.msk [vmem:[%s1755_s25 + $0x68] sm:$0xf] %vm1128_vm2, %v1122_v28 }
 0x1d8   : > { %v888_v36 = vmax.f32 %v843_v33, 0.0  ;;  %v995_v37 = vadd.f32 %v1738_v45, %v994_v34  ;;  %v1123_v31 = vpack.c.bf16 %v1091_v29, %v1091_v29 }
 0x1da   : > { %v908_v38 = vpack.c.bf16 %v888_v36, %v887_v35  ;;  %v1069_v39 = vmul.f32 %v1743_v52, %v995_v37  ;;  %1156 = vst.msk [vmem:[%s1755_s25 + $0x6c] sm:$0xf] %vm1128_vm2, %v1123_v31 }
 0x1db   : > { %v1052_v33 = vpop.f32.mrf.mxu3 }
 0x1dc   : > { %v1101_v40 = vpack.c.bf16 %v1069_v39, %v1069_v39  ;;  %1396 = vmatmul.msk.bf16.gmra.mxu2 %vm727_vm1, %v908_v38  ;;  %v1053_v37 = vadd.f32 %v1738_v45, %v1052_v33 }
 0x1dd   : > { %v845_v17 = vpop.f32.mrf.mxu1 }
 0x1de   : > { %1134 = vst.msk [vmem:[%s1755_s25 + $0x14] sm:$0xf] %vm1128_vm2, %v1101_v40  ;;  %v846_v47 = vadd.f32 %v845_v17, %v713_v43  ;;  %v1092_v17 = vmul.f32 %v1743_v52, %v1053_v37 }
 0x1df   : > { %v997_v41 = vpop.f32.mrf.mxu2 }
 0x1e0   : > { %v998_v42 = vadd.f32 %v1738_v45, %v997_v41  ;;  %v889_v5 = vmax.f32 %v846_v47, 0.0  ;;  %v1124_v43 = vpack.c.bf16 %v1092_v17, %v1092_v17 }
 0x1e2   : > { %v1070_v44 = vmul.f32 %v1743_v52, %v998_v42  ;;  %1157 = vst.msk [vmem:[%s1755_s25 + $0x70] sm:$0xf] %vm1128_vm2, %v1124_v43 }
 0x1e3   : > { %v1054_v39 = vpop.f32.mrf.mxu3 }
 0x1e4   : > { %v1102_v48 = vpack.c.bf16 %v1070_v44, %v1070_v44  ;;  %v1055_v41 = vadd.f32 %v1738_v45, %v1054_v39 }
 0x1e5   : > { %v847_v49 = vpop.f32.mrf.mxu1 }
 0x1e6   : > { %1135 = vst.msk [vmem:[%s1755_s25 + $0x18] sm:$0xf] %vm1128_vm2, %v1102_v48  ;;  %v848_v50 = vadd.f32 %v847_v49, %v714_v46  ;;  %v1093_v44 = vmul.f32 %v1743_v52, %v1055_v41 }
 0x1e7   : > { %v999_v51 = vpop.f32.mrf.mxu2 }
 0x1e8   : > { %v890_v53 = vmax.f32 %v848_v50, 0.0  ;;  %v1000_v54 = vadd.f32 %v1738_v45, %v999_v51  ;;  %v1125_v47 = vpack.c.bf16 %v1093_v44, %v1093_v44 }
 0x1ea   : > { %v909_v55 = vpack.c.bf16 %v890_v53, %v889_v5  ;;  %v1071_v56 = vmul.f32 %v1743_v52, %v1000_v54  ;;  %1158 = vst.msk [vmem:[%s1755_s25 + $0x74] sm:$0xf] %vm1128_vm2, %v1125_v47 }
 0x1ec   : > { %v1103_v57 = vpack.c.bf16 %v1071_v56, %v1071_v56  ;;  %1397 = vmatmul.msk.bf16.gmra.mxu2 %vm727_vm1, %v909_v55 }
 0x1ee   : > { %1136 = vst.msk [vmem:[%s1755_s25 + $0x1c] sm:$0xf] %vm1128_vm2, %v1103_v57 }
 0x1ef   : > { %v1002_v58 = vpop.f32.mrf.mxu2 }
 0x1f0   : > { %v1003_v59 = vadd.f32 %v1738_v45, %v1002_v58 }
 0x1f2   : > { %v1072_v60 = vmul.f32 %v1743_v52, %v1003_v59 }
 0x1f4   : > { %v1104_v61 = vpack.c.bf16 %v1072_v60, %v1072_v60 }
 0x1f6   : > { %1137 = vst.msk [vmem:[%s1755_s25 + $0x20] sm:$0xf] %vm1128_vm2, %v1104_v61 }
 0x1f7   : > { %v1004_v62 = vpop.f32.mrf.mxu2 }
 0x1f8   : > { %v1005_v63 = vadd.f32 %v1738_v45, %v1004_v62 }
 0x1fa   : > { %v1073_v0 = vmul.f32 %v1743_v52, %v1005_v63 }
 0x1fc   : > { %v1105_v1 = vpack.c.bf16 %v1073_v0, %v1073_v0 }
 0x1fd   : > { %v1057_v49 = vpop.f32.mrf.mxu3 }
 0x1fe   : > { %1138 = vst.msk [vmem:[%s1755_s25 + $0x24] sm:$0xf] %vm1128_vm2, %v1105_v1  ;;  %v1058_v53 = vadd.f32 %v1738_v45, %v1057_v49 }
 0x1ff   : > { %v1007_v2 = vpop.f32.mrf.mxu2 }
 0x200   : > { %v1008_v3 = vadd.f32 %v1738_v45, %v1007_v2  ;;  %v1094_v57 = vmul.f32 %v1743_v52, %v1058_v53 }
 0x202   : > { %v1074_v4 = vmul.f32 %v1743_v52, %v1008_v3  ;;  %v1126_v60 = vpack.c.bf16 %v1094_v57, %v1094_v57 }
 0x204   : > { %v1106_v6 = vpack.c.bf16 %v1074_v4, %v1074_v4  ;;  %1159 = vst.msk [vmem:[%s1755_s25 + $0x78] sm:$0xf] %vm1128_vm2, %v1126_v60 }
 0x205   : > { %v1059_v55 = vpop.f32.mrf.mxu3 }
 0x206   : > { %1139 = vst.msk [vmem:[%s1755_s25 + $0x28] sm:$0xf] %vm1128_vm2, %v1106_v6  ;;  %v1060_v58 = vadd.f32 %v1738_v45, %v1059_v55 }
 0x207   : > { %v1009_v7 = vpop.f32.mrf.mxu2 }
 0x208   : > { %v1010_v8 = vadd.f32 %v1738_v45, %v1009_v7  ;;  %v1095_v61 = vmul.f32 %v1743_v52, %v1060_v58 }
 0x20a   : > { %v1075_v9 = vmul.f32 %v1743_v52, %v1010_v8  ;;  %v1127_v63 = vpack.c.bf16 %v1095_v61, %v1095_v61 }
 0x20c   : > { %v1107_v10 = vpack.c.bf16 %v1075_v9, %v1075_v9  ;;  %1160 = vst.msk [vmem:[%s1755_s25 + $0x7c] sm:$0xf] %vm1128_vm2, %v1127_v63 }
 0x20e   : > { %1140 = vst.msk [vmem:[%s1755_s25 + $0x2c] sm:$0xf] %vm1128_vm2, %v1107_v10 }
 0x20f   : > { %v1012_v11 = vpop.f32.mrf.mxu2 }
 0x210   : > { %v1013_v12 = vadd.f32 %v1738_v45, %v1012_v11 }
 0x212   : > { %v1076_v13 = vmul.f32 %v1743_v52, %v1013_v12 }
 0x214   : > { %v1108_v14 = vpack.c.bf16 %v1076_v13, %v1076_v13 }
 0x216   : > { %1141 = vst.msk [vmem:[%s1755_s25 + $0x30] sm:$0xf] %vm1128_vm2, %v1108_v14 }
 0x217   : > { %v1014_v15 = vpop.f32.mrf.mxu2 }
 0x218   : > { %v1015_v18 = vadd.f32 %v1738_v45, %v1014_v15 }
 0x21a   : > { %v1077_v19 = vmul.f32 %v1743_v52, %v1015_v18 }
 0x21c   : > { %v1109_v20 = vpack.c.bf16 %v1077_v19, %v1077_v19 }
 0x21e   : > { %1142 = vst.msk [vmem:[%s1755_s25 + $0x34] sm:$0xf] %vm1128_vm2, %v1109_v20 }
 0x21f   : > { %v1017_v22 = vpop.f32.mrf.mxu2 }
 0x220   : > { %v1018_v24 = vadd.f32 %v1738_v45, %v1017_v22 }
 0x222   : > { %v1078_v27 = vmul.f32 %v1743_v52, %v1018_v24 }
 0x224   : > { %v1110_v30 = vpack.c.bf16 %v1078_v27, %v1078_v27 }
 0x226   : > { %1143 = vst.msk [vmem:[%s1755_s25 + $0x38] sm:$0xf] %vm1128_vm2, %v1110_v30 }
 0x227   : > { %v1019_v32 = vpop.f32.mrf.mxu2 }
 0x228   : > { %v1020_v34 = vadd.f32 %v1738_v45, %v1019_v32 }
 0x22a   : > { %v1079_v35 = vmul.f32 %v1743_v52, %v1020_v34 }
 0x22c   : > { %v1111_v36 = vpack.c.bf16 %v1079_v35, %v1079_v35 }
 0x22e   : > { %1144 = vst.msk [vmem:[%s1755_s25 + $0x3c] sm:$0xf] %vm1128_vm2, %v1111_v36 }
 0x22f   : > { %v1022_v38 = vpop.f32.mrf.mxu2 }
 0x230   : > { %v1023_v40 = vadd.f32 %v1738_v45, %v1022_v38 }
 0x232   : > { %v1080_v42 = vmul.f32 %v1743_v52, %v1023_v40 }
 0x234   : > { %v1112_v46 = vpack.c.bf16 %v1080_v42, %v1080_v42 }
 0x236   : > { %1145 = vst.msk [vmem:[%s1755_s25 + $0x40] sm:$0xf] %vm1128_vm2, %v1112_v46 }
 0x237   : > { %v1024_v48 = vpop.f32.mrf.mxu2 }
 0x238   : > { %v1025_v50 = vadd.f32 %v1738_v45, %v1024_v48 }
 0x23a   : > { %v1081_v51 = vmul.f32 %v1743_v52, %v1025_v50 }
 0x23c   : > { %v1113_v5 = vpack.c.bf16 %v1081_v51, %v1081_v51 }
 0x23e   : > { %1146 = vst.msk [vmem:[%s1755_s25 + $0x44] sm:$0xf] %vm1128_vm2, %v1113_v5 }
 0x23f   : > { %v1027_v54 = vpop.f32.mrf.mxu2 }
 0x240   : > { %v1028_v56 = vadd.f32 %v1738_v45, %v1027_v54 }
 0x242   : > { %v1082_v59 = vmul.f32 %v1743_v52, %v1028_v56 }
 0x244   : > { %v1114_v62 = vpack.c.bf16 %v1082_v59, %v1082_v59 }
 0x246   : > { %1147 = vst.msk [vmem:[%s1755_s25 + $0x48] sm:$0xf] %vm1128_vm2, %v1114_v62 }
 0x247   : > { %v1029_v0 = vpop.f32.mrf.mxu2 }
 0x248   : > { %v1030_v1 = vadd.f32 %v1738_v45, %v1029_v0 }
 0x24a   : > { %v1083_v2 = vmul.f32 %v1743_v52, %v1030_v1 }
 0x24c   : > { %v1115_v3 = vpack.c.bf16 %v1083_v2, %v1083_v2 }
 0x24e   : > { %1148 = vst.msk [vmem:[%s1755_s25 + $0x4c] sm:$0xf] %vm1128_vm2, %v1115_v3 }
 0x24f   : > { %v1032_v4 = vpop.f32.mrf.mxu2 }
 0x250   : > { %v1033_v6 = vadd.f32 %v1738_v45, %v1032_v4 }
 0x252   : > { %v1084_v7 = vmul.f32 %v1743_v52, %v1033_v6 }
 0x254   : > { %v1116_v8 = vpack.c.bf16 %v1084_v7, %v1084_v7 }
 0x256   : > { %1149 = vst.msk [vmem:[%s1755_s25 + $0x50] sm:$0xf] %vm1128_vm2, %v1116_v8 }
 0x257   : > { %v1034_v9 = vpop.f32.mrf.mxu2 }
 0x258   : > { %v1035_v10 = vadd.f32 %v1738_v45, %v1034_v9 }
 0x25a   : > { %v1085_v11 = vmul.f32 %v1743_v52, %v1035_v10 }
 0x25c   : > { %v1117_v12 = vpack.c.bf16 %v1085_v11, %v1085_v11 }
 0x25e   : > { %1150 = vst.msk [vmem:[%s1755_s25 + $0x54] sm:$0xf] %vm1128_vm2, %v1117_v12 }
 0x25f   : > { %v1037_v13 = vpop.f32.mrf.mxu2 }
 0x260   : > { %v1038_v14 = vadd.f32 %v1738_v45, %v1037_v13 }
 0x262   : > { %v1086_v15 = vmul.f32 %v1743_v52, %v1038_v14 }
 0x264   : > { %v1118_v16 = vpack.c.bf16 %v1086_v15, %v1086_v15 }
 0x266   : > { %1151 = vst.msk [vmem:[%s1755_s25 + $0x58] sm:$0xf] %vm1128_vm2, %v1118_v16 }
 0x267   : > { %v1039_v18 = vpop.f32.mrf.mxu2 }
 0x268   : > { %v1040_v19 = vadd.f32 %v1738_v45, %v1039_v18 }
 0x26a   : > { %v1087_v20 = vmul.f32 %v1743_v52, %v1040_v19 }
 0x26c   : > { %v1119_v21 = vpack.c.bf16 %v1087_v20, %v1087_v20 }
 0x26e   : > { %1152 = vst.msk [vmem:[%s1755_s25 + $0x5c] sm:$0xf] %vm1128_vm2, %v1119_v21 }
 0x26f   : > { %v1042_v22 = vpop.f32.mrf.mxu2 }
 0x270   : > { %v1043_v23 = vadd.f32 %v1738_v45, %v1042_v22 }
 0x272   : > { %v1088_v24 = vmul.f32 %v1743_v52, %v1043_v23 }
 0x274   : > { %v1120_v25 = vpack.c.bf16 %v1088_v24, %v1088_v24 }
 0x276   : > { %1153 = vst.msk [vmem:[%s1755_s25 + $0x60] sm:$0xf] %vm1128_vm2, %v1120_v25 }
 0x277   : > { %v1044_v26 = vpop.f32.mrf.mxu2 }
 0x278   : > { %v1045_v27 = vadd.f32 %v1738_v45, %v1044_v26 }
 0x27a   : > { %v1089_v28 = vmul.f32 %v1743_v52, %v1045_v27 }
 0x27c   : > { %v1121_v29 = vpack.c.bf16 %v1089_v28, %v1089_v28 }
 0x27e   : > { %1154 = vst.msk [vmem:[%s1755_s25 + $0x64] sm:$0xf] %vm1128_vm2, %v1121_v29 }
 0x27f PF: > { %s19_s9 = sadd.s32 1, %s1477_s9   ;;  %s1927_s29 = smov %s1473_s30 }
 0x280   : > { %p16_p5 = scmp.ge.s32.totalorder %s19_s9, 4   ;;  %s1928_s30 = smov %s1930_s0 }
 0x282   :  { %18 = sbr.rel (!%p16_p5) target bundleno = 2 (0x2), region = 85 }

</bundles_post_ra>
